<compile_context>
chip_gen: v7x
topology: tpu7x:2x2x1
jax: 0.10.0
libtpu: 0.0.40
codegen_flags: <defaults>
</compile_context>

<pallas_src>
import functools

import numpy as np
import jax
import jax.numpy as jnp
from jax import lax
from jax.experimental import pallas as pl
from jax.experimental.pallas import tpu as pltpu


def _cdiv(a: int, b: int) -> int:
    return -(-a // b)


def _round_up(x: int, m: int) -> int:
    return _cdiv(x, m) * m


# Contract on axis 1 of both operands: x (tm, tk) x w (tn, tk) -> (tm, tn).
_NT = (((1,), (1,)), ((), ()))


# -----------------------------------------------------------------------------
# Tile selection
# -----------------------------------------------------------------------------
@functools.lru_cache(maxsize=None)
def _tile_caps():
    """Per-generation tile caps derived from physical VMEM capacity."""
    try:
        vmem_cap = int(pltpu.get_tpu_info().vmem_capacity_bytes)
    except Exception:
        vmem_cap = 64 << 20  # conservative fallback: v7x per-TensorCore VMEM
    if vmem_cap >= (96 << 20):
        # v5e / v6e: 128 MiB VMEM -> bigger N tiles raise arithmetic intensity
        # (fewer x re-reads per N-tile) and keep the f32 path compute-bound.
        return 512, 1024, 512
    # v7x: 64 MiB VMEM -> keep the double-buffered footprint small; it's
    # already compute-bound at 3.2 TB/s HBM.
    return 512, 512, 512


def _pick_tile(dim: int, cap: int, align: int) -> int:
    """Balanced tile: minimal #tiles with per-tile size <= cap, then the smallest
    `align`-aligned tile that still covers `dim` in that many tiles.  When the
    whole dim fits in one tile, use the exact dim (a full-extent block is always
    layout-legal and carries zero padding)."""
    if dim <= cap:
        return dim
    n_tiles = _cdiv(dim, cap)
    return min(_round_up(_cdiv(dim, n_tiles), align), cap)


# -----------------------------------------------------------------------------
# Kernels
# -----------------------------------------------------------------------------
def _mask_k_tail(x, w, k_rem, tk):
    """Zero the out-of-range K columns of both operands on the last K step.

    Pallas partial edge blocks contain unspecified data in the OOB region; both
    operands are masked so arbitrary bit patterns (incl. NaN/Inf) cannot leak
    into valid outputs.  `k_rem` / `tk` are static, so this code is compiled in
    only for raggedly K-tiled problems."""
    if not k_rem:
        return x, w
    valid = jnp.where(pl.program_id(2) == pl.num_programs(2) - 1, k_rem, tk)
    x = jnp.where(lax.broadcasted_iota(jnp.int32, x.shape, 1) < valid, x, jnp.zeros_like(x))
    w = jnp.where(lax.broadcasted_iota(jnp.int32, w.shape, 1) < valid, w, jnp.zeros_like(w))
    return x, w


def _linear_kernel_single(x_ref, w_ref, o_ref, *, k_rem, tk):
    """K fits in one block: write the output tile directly (no accumulator)."""
    x, w = _mask_k_tail(x_ref[...], w_ref[...], k_rem, tk)
    o_ref[...] = lax.dot_general(
        x, w, _NT, preferred_element_type=jnp.float32
    ).astype(o_ref.dtype)


def _linear_kernel_accout(x_ref, w_ref, o_ref, *, k_rem, tk):
    """K tiled, f32 output: accumulate directly into the VMEM-resident output
    block (out index_map ignores k) -- no scratch, no final copy."""

    @pl.when(pl.program_id(2) == 0)
    def _():
        o_ref[...] = jnp.zeros_like(o_ref)

    x, w = _mask_k_tail(x_ref[...], w_ref[...], k_rem, tk)
    o_ref[...] += lax.dot_general(x, w, _NT, preferred_element_type=jnp.float32)


def _linear_kernel_scratch(x_ref, w_ref, o_ref, acc_ref, *, k_rem, tk):
    """K tiled, sub-f32 output (e.g. bf16): accumulate in f32 scratch, cast once."""

    @pl.when(pl.program_id(2) == 0)
    def _():
        acc_ref[...] = jnp.zeros_like(acc_ref)

    x, w = _mask_k_tail(x_ref[...], w_ref[...], k_rem, tk)
    acc_ref[...] += lax.dot_general(x, w, _NT, preferred_element_type=jnp.float32)

    @pl.when(pl.program_id(2) == pl.num_programs(2) - 1)
    def _():
        o_ref[...] = acc_ref[...].astype(o_ref.dtype)


# -----------------------------------------------------------------------------
# pallas_call wrapper
# -----------------------------------------------------------------------------
@functools.partial(jax.jit, static_argnames=("tm", "tn", "tk", "out_dtype"))
def _linear_pallas(x, w, *, tm, tn, tk, out_dtype):
    """x: (M, K), w: (N, K) PyTorch layout -> (M, N) = x @ w.T."""
    M, K = x.shape
    N, _ = w.shape

    gm, gn, gk = _cdiv(M, tm), _cdiv(N, tn), _cdiv(K, tk)
    k_rem = K % tk  # static; nonzero only when K is tiled raggedly

    if gk == 1:
        kernel = functools.partial(_linear_kernel_single, k_rem=k_rem, tk=tk)
        scratch = []
    elif np.dtype(out_dtype) == jnp.float32:
        kernel = functools.partial(_linear_kernel_accout, k_rem=k_rem, tk=tk)
        scratch = []
    else:
        kernel = functools.partial(_linear_kernel_scratch, k_rem=k_rem, tk=tk)
        scratch = [pltpu.VMEM((tm, tn), jnp.float32)]

    # Footprint-derived VMEM budget: double-buffered inputs + double-buffered
    # output (+ f32 scratch if any) + headroom for Mosaic internal scratch.
    # Capped at 48 MiB so it also fits v7x's 64 MiB physical VMEM.
    isz = x.dtype.itemsize
    osz = np.dtype(out_dtype).itemsize
    vmem_need = 2 * (tm * tk + tn * tk) * isz + 2 * tm * tn * osz
    vmem_need += tm * tn * 4 if scratch else 0
    vmem_limit = int(min(max(vmem_need + (8 << 20), 16 << 20), 48 << 20))

    return pl.pallas_call(
        kernel,
        out_shape=jax.ShapeDtypeStruct((M, N), out_dtype),
        grid_spec=pltpu.PrefetchScalarGridSpec(
            num_scalar_prefetch=0,
            grid=(gm, gn, gk),
            in_specs=[
                pl.BlockSpec((tm, tk), lambda i, j, k: (i, k)),
                # Weight stays in PyTorch (N, K) layout; contracted on K inside
                # the kernel -> no HBM transpose pass, no wrapper-side copies.
                pl.BlockSpec((tn, tk), lambda i, j, k: (j, k)),
            ],
            out_specs=pl.BlockSpec((tm, tn), lambda i, j, k: (i, j)),
            scratch_shapes=scratch,
        ),
        compiler_params=pltpu.CompilerParams(
            # (i, j) parallel -> megacore / both v7x TensorCores get work when
            # the parallel grid has >= 2 tiles; k innermost, arbitrary.
            dimension_semantics=("parallel", "parallel", "arbitrary"),
            vmem_limit_bytes=vmem_limit,
        ),
        # NOTE: if profiling shows exposed DMA for deep-K, small-tm problems,
        # prefer raising tm first; only then add pipeline_mode=pl.Buffered(3)
        # to the two in_specs.
    )(x, w)


# -----------------------------------------------------------------------------
# Public entry point: semantics of torch.nn.Linear(in, out, bias=False)
# -----------------------------------------------------------------------------
def linear_no_bias(x, w, *, force_pallas=False, use_bf16=False):
    """Equivalent of M.forward(x): x @ w.T with w in PyTorch (out, in) layout.

    x: (..., in_features);  w: (out_features, in_features).
    use_bf16=True (opt-in) casts operands to bf16 with f32 accumulation.
    """
    *lead, K = x.shape
    N, K2 = w.shape
    assert K == K2, "in_features mismatch"
    out_dtype = x.dtype
    w = w.astype(x.dtype)

    x2 = x.reshape(-1, K)
    M = x2.shape[0]

    # Tiny problems: a standalone pallas_call is pure launch overhead; let XLA
    # handle / fuse it (explicit f32 accumulation to match the Pallas path).
    if not force_pallas and (M < 16 or M * N * K < (1 << 21)):
        out = lax.dot_general(
            x2, w, _NT,
            precision=lax.Precision.HIGHEST,
            preferred_element_type=jnp.float32,
        ).astype(out_dtype)
        return out.reshape(*lead, N)

    if use_bf16 and x2.dtype == jnp.float32:
        # bf16 operands, f32 accumulation, f32 output: ~4x MXU rate, half the
        # HBM bytes on v6e/v7x where numerically acceptable.
        x2 = x2.astype(jnp.bfloat16)
        w = w.astype(jnp.bfloat16)

    # Balanced, padding-minimizing tiles (generation-aware caps).
    #   tm: sublane-aligned (mult of 8)      -- or the exact M when it fits
    #   tn: lane-dense output (mult of 128)  -- or the exact N when it fits
    #   tk: mult of 128                       -- or the exact K when it fits
    tm_cap, tn_cap, tk_cap = _tile_caps()
    tm = _pick_tile(M, tm_cap, 8)
    tn = _pick_tile(N, tn_cap, 128)
    tk = _pick_tile(K, tk_cap, 128)

    out = _linear_pallas(x2, w, tm=tm, tn=tn, tk=tk, out_dtype=out_dtype)
    return out.reshape(*lead, N)


if __name__ == "__main__":
    key = jax.random.PRNGKey(0)
    ks = jax.random.split(key, 6)

    # --- Case 1: module config M(in=32, out=128), batch=8 (single-block path) -
    in_features, out_features, batch = 32, 128, 8
    x = jax.random.normal(ks[0], (batch, in_features), dtype=jnp.float32)
    bound = 1.0 / (in_features ** 0.5)  # PyTorch Linear init bound
    w = jax.random.uniform(ks[1], (out_features, in_features), dtype=jnp.float32,
                           minval=-bound, maxval=bound)
    y = jax.block_until_ready(linear_no_bias(x, w, force_pallas=True))
    y_ref = jnp.dot(x, w.T, precision=lax.Precision.HIGHEST)
    assert y.shape == (batch, out_features)
    assert jnp.allclose(y, y_ref, atol=1e-5, rtol=1e-5), "mismatch (case 1)"

    # --- Case 2: ragged deep K -> K-tiled accumulate-into-output + K-tail mask -
    M2, K2_, N2 = 100, 640, 384
    x2 = jax.random.normal(ks[2], (M2, K2_), dtype=jnp.float32)
    w2 = jax.random.uniform(ks[3], (N2, K2_), dtype=jnp.float32,
                            minval=-0.05, maxval=0.05)
    y2 = jax.block_until_ready(linear_no_bias(x2, w2, force_pallas=True))
    y2_ref = jnp.dot(x2, w2.T, precision=lax.Precision.HIGHEST)
    assert y2.shape == (M2, N2)
    assert jnp.allclose(y2, y2_ref, atol=1e-3, rtol=1e-3), "mismatch (case 2)"

    # --- Case 3: M > tile cap -> partial M edge blocks, no pad/slice copies ---
    M3, K3, N3 = 700, 256, 640
    x3 = jax.random.normal(ks[4], (M3, K3), dtype=jnp.float32)
    w3 = jax.random.normal(ks[5], (N3, K3), dtype=jnp.float32) * 0.05
    y3 = jax.block_until_ready(linear_no_bias(x3, w3, force_pallas=True))
    y3_ref = jnp.dot(x3, w3.T, precision=lax.Precision.HIGHEST)
    assert y3.shape == (M3, N3)
    assert jnp.allclose(y3, y3_ref, atol=1e-3, rtol=1e-3), "mismatch (case 3)"

    # --- Case 4: opt-in bf16 compute path (f32 accumulation) ------------------
    yb = jax.block_until_ready(
        linear_no_bias(x3, w3, force_pallas=True, use_bf16=True))
    yb_ref = jnp.dot(x3.astype(jnp.bfloat16), w3.astype(jnp.bfloat16).T,
                     preferred_element_type=jnp.float32)
    assert jnp.allclose(yb, yb_ref, atol=5e-2, rtol=5e-2), "mismatch (case 4)"

    print("KERNEL_OK")
</pallas_src>

<mosaic_0001>
module attributes {stable_mosaic.version = 11 : i64} {
  func.func @_linear_kernel_single(%arg0: i32, %arg1: i32, %arg2: i32, %arg3: memref<8x32xf32, #tpu.memory_space<vmem>>, %arg4: memref<128x32xf32, #tpu.memory_space<vmem>>, %arg5: memref<8x128xf32, #tpu.memory_space<vmem>>) attributes {dimension_semantics = [#tpu.dimension_semantics<parallel>, #tpu.dimension_semantics<parallel>, #tpu.dimension_semantics<arbitrary>], iteration_bounds = array<i64: 1, 1, 1>, scalar_prefetch = 0 : i64, scratch_operands = 0 : i64, tpu.core_type = #tpu.core_type<tc>, window_params = [{transform_indices = @transform_0, window_bounds = array<i64: 8, 32>}, {transform_indices = @transform_1, window_bounds = array<i64: 128, 32>}, {transform_indices = @transform_2, window_bounds = array<i64: 8, 128>}]} {
    %c0 = arith.constant 0 : index
    %c0_0 = arith.constant 0 : index
    %0 = vector.load %arg3[%c0, %c0_0] : memref<8x32xf32, #tpu.memory_space<vmem>>, vector<8x32xf32>
    %c0_1 = arith.constant 0 : index
    %c0_2 = arith.constant 0 : index
    %1 = vector.load %arg4[%c0_1, %c0_2] : memref<128x32xf32, #tpu.memory_space<vmem>>, vector<128x32xf32>
    %cst = arith.constant dense<0.000000e+00> : vector<8x128xf32>
    %2 = tpu.matmul %0, %1, %cst {dimension_numbers = #tpu.dot_dimension_numbers<[1], [1], [0], [0], [0, 0, 1, 0], [], []>} : vector<8x32xf32>, vector<128x32xf32>, vector<8x128xf32> -> vector<8x128xf32>
    %c0_3 = arith.constant 0 : index
    %c0_4 = arith.constant 0 : index
    %3 = vector.load %arg5[%c0_3, %c0_4] : memref<8x128xf32, #tpu.memory_space<vmem>>, vector<8x128xf32>
    tpu.vector_store %arg5[%c0_3, %c0_4], %2 {strides = array<i32>} : memref<8x128xf32, #tpu.memory_space<vmem>>, vector<8x128xf32>,
    return
  }
  func.func @transform_0(%arg0: i32, %arg1: i32, %arg2: i32) -> (i32, i32) {
    %c0_i32 = arith.constant 0 : i32
    return %arg0, %arg2 : i32, i32
  }
  func.func @transform_1(%arg0: i32, %arg1: i32, %arg2: i32) -> (i32, i32) {
    %c0_i32 = arith.constant 0 : i32
    return %arg1, %arg2 : i32, i32
  }
  func.func @transform_2(%arg0: i32, %arg1: i32, %arg2: i32) -> (i32, i32) {
    %c0_i32 = arith.constant 0 : i32
    return %arg0, %arg1 : i32, i32
  }
}

</mosaic_0001>

<bundles_post_ra>
// kernel: _linear_pallas.1
= control target key start
LH: loop header
LB: loop body
LE: loop exit
PB: predicated region body
PF: predicated region fallthrough
CT: control target
= control target key end

     0   :  { %vm29_vm0 = vcmask 261120   ;;  %v295_v2 = vmov 0.0|0.0   ;;  %vm296_vm2 = vmmov 0   ;;  %v297_v5 = vmov 0.0   ;;  %s400_s0 = inlined_call_operand.vmem [shape: f32[8,32], index: 0, kind: input, shape index: {}]   ;;  %s401_s1 = inlined_call_operand.vmem [shape: f32[128,32], index: 1, kind: input, shape index: {}]   ;;  %s402_s2 = inlined_call_operand.hbm [shape: f32[8,128], index: 2, kind: output, shape index: {}]  }
   0x1   :  { %v13_v0 = vld [vmem:[%s401_s1] sm:$0xff]  ;;  %v14_v1 = vld [vmem:[%s401_s1 + $0x8] sm:$0xff]  ;;  %235 = vmatprep.subr.bf16.mxu0 %v295_v2  ;;  %vm322_vm1 = vmpackc.low %vm29_vm0, %vm29_vm0  ;;  %232 = vmatprep.mubr.msk.f32.mxu0 %vm296_vm2, %v297_v5 }
   0x2   :  { %v236_v3 = vpack.c.bf16 %v14_v1, %v13_v0  ;;  %v15_v6 = vld [vmem:[%s401_s1 + $0x10] sm:$0xff]  ;;  %v16_v7 = vld [vmem:[%s401_s1 + $0x18] sm:$0xff] }
   0x4   :  { %238 = vmatpush3.bf16.xpose.msk.msra.mxu0 %vm322_vm1, %v236_v3 }
   0x5   :  { %239 = vmatprep.subr.bf16.mxu0 %v295_v2 }
   0x6   :  { %7 = vsyncpa [#allocation3], 0  ;;  %v240_v8 = vpack.c.bf16 %v16_v7, %v15_v6  ;;  %v17_v9 = vld [vmem:[%s401_s1 + $0x20] sm:$0xff]  ;;  %v18_v10 = vld [vmem:[%s401_s1 + $0x28] sm:$0xff]  ;;  %s298_s15 = smov [#allocation2]  }
   0x7   :  { %v244_v11 = vpack.c.bf16 %v18_v10, %v17_v9  ;;  %v19_v12 = vld [vmem:[%s401_s1 + $0x30] sm:$0xff]  ;;  %v20_v13 = vld [vmem:[%s401_s1 + $0x38] sm:$0xff]  ;;  %v21_v15 = vld [vmem:[%s401_s1 + $0x40] sm:$0xff]  ;;  %s158_s16 = sshll.u32 %s298_s15, 4  ;;  %s159_s16 = int_to_ptr.vmem [resolvable:$true] %s158_s16 }
   0x8   :  { %v248_v14 = vpack.c.bf16 %v20_v13, %v19_v12  ;;  %v22_v16 = vld [vmem:[%s401_s1 + $0x48] sm:$0xff]  ;;  %v23_v18 = vld [vmem:[%s401_s1 + $0x50] sm:$0xff]  ;;  %v24_v19 = vld [vmem:[%s401_s1 + $0x58] sm:$0xff]  ;;  %s271_s17 = scalar_lea.vmem %s159_s16, 128  ;;  %p276_p1 = scmp.lt.s32.totalorder %s159_s16, %s159_s16 }
   0x9   :  { %v252_v17 = vpack.c.bf16 %v22_v16, %v21_v15  ;;  %v256_v20 = vpack.c.bf16 %v24_v19, %v23_v18  ;;  %v25_v21 = vld [vmem:[%s401_s1 + $0x60] sm:$0xff]  ;;  %v26_v22 = vld [vmem:[%s401_s1 + $0x68] sm:$0xff]  ;;  %v27_v24 = vld [vmem:[%s401_s1 + $0x70] sm:$0xff]  ;;  %p272_p0 = scmp.ne.s32.totalorder %s159_s16, %s271_s17  ;;  %p277_p2 = scmp.lt.s32.totalorder %s271_s17, %s271_s17 }
   0xa   :  { %v260_v23 = vpack.c.bf16 %v26_v22, %v25_v21  ;;  %v28_v25 = vld [vmem:[%s401_s1 + $0x78] sm:$0xff]  ;;  %v12_v27 = vld [vmem:[%s400_s0] sm:$0xff] }
   0xb   :  { %v264_v26 = vpack.c.bf16 %v28_v25, %v27_v24  ;;  %p278_p3 = por %p277_p2, %p276_p1 }
   0xc   :  { %242 = vmatpush3.bf16.xpose.msk.msra.mxu0 %vm322_vm1, %v240_v8 }
   0xd   :  { %243 = vmatprep.subr.bf16.mxu0 %v295_v2  ;;  %p279_p4 = pnand %p278_p3, %p272_p0 }
  0x14   :  { %246 = vmatpush3.bf16.xpose.msk.msra.mxu0 %vm322_vm1, %v244_v11 }
  0x15   :  { %247 = vmatprep.subr.bf16.mxu0 %v295_v2 }
  0x1c   :  { %250 = vmatpush3.bf16.xpose.msk.msra.mxu0 %vm322_vm1, %v248_v14 }
  0x1d   :  { %251 = vmatprep.subr.bf16.mxu0 %v295_v2 }
  0x24   :  { %254 = vmatpush3.bf16.xpose.msk.msra.mxu0 %vm322_vm1, %v252_v17 }
  0x25   :  { %255 = vmatprep.subr.bf16.mxu0 %v295_v2 }
  0x2c   :  { %258 = vmatpush3.bf16.xpose.msk.msra.mxu0 %vm322_vm1, %v256_v20 }
  0x2d   :  { %259 = vmatprep.subr.bf16.mxu0 %v295_v2 }
  0x34   :  { %262 = vmatpush3.bf16.xpose.msk.msra.mxu0 %vm322_vm1, %v260_v23 }
  0x35   :  { %263 = vmatprep.subr.bf16.mxu0 %v295_v2 }
  0x3c   :  { %266 = vmatpush3.bf16.xpose.msk.msra.mxu0 %vm322_vm1, %v264_v26 }
  0x43   :  { %233 = vmatmul.mubr.msk.f32.vlgmr.msra.gmra.mrb[0].mxu0 %vm29_vm0, %v12_v27 }
 0x116   :  { %v147_v28 = vpop.f32.mrb[0].mxu0 }
 0x117   :  { %151 = vst [vmem:[#allocation2] sm:$0xff] %v147_v28  ;;  %v234_v29 = vpop.f32.mrb[1].mxu0 }
 0x118   :  { %282 = shalt.err (!%p279_p4)
}
 0x119   :  { %s283_s19 = scalar_lea.hbm %s402_s2, 128 }
 0x11a   :  { %p284_p5 = scmp.ne.s32.totalorder %s402_s2, %s283_s19  ;;  %p287_p6 = scmp.lt.u32.totalorder %s283_s19, %s402_s2 }
 0x11c   :  { %p289_p7 = pnand %p287_p6, %p284_p5 }
 0x11e   :  { %292 = shalt.err (!%p289_p7)
}
 0x11f   :  { %161 = dma.vmem_to_hbm [thread:$0]  %s159_s16, 128, %s402_s2, [#allocation3]  }
 0x120   :  { %293 = dma.done.wait [#allocation3], 128  }
 0x121   :  { %294 = vsyncadd [#allocation3], 4294967168 }
 0x122   :  { %165 = vsyncpa [#allocation3], 1 }

</bundles_post_ra>
